<compile_context>
chip_gen: v6e
topology: v6e:2x2x1
jax: 0.10.0
libtpu: 0.0.40
codegen_flags: <defaults>
</compile_context>

<pallas_src>
import jax
import jax.numpy as jnp
from jax import lax
from jax.experimental import pallas as pl
from jax.experimental.pallas import tpu as pltpu


def _regression_baseline_kernel(x_ref, wt_ref, bt_ref, out_ref):
    # x_ref: [TM, D]   wt_ref: [2, D]   bt_ref: [2, 1]   out_ref: [2, TM]
    # pred_t[k, t] = sum_d wt[k, d] * x[t, d]  -> lane-dense [2, TM] result,
    # computed as an NT matmul (both contracting dims are the last dim), so the
    # large x tile stays in its natural [rows, D] layout for the MXU.
    pred_t = lax.dot_general(
        wt_ref[...], x_ref[...],
        dimension_numbers=(((1,), (1,)), ((), ())),
        preferred_element_type=jnp.float32,
        precision=lax.Precision.HIGHEST,
    ) + bt_ref[...]                                       # [2, TM]
    mu_row = pred_t[0:1, :]                               # row 0: mu, as-is
    sigma_row = jnp.exp(pred_t[1:2, :])                   # row 1: exp(log_sigma)
    out_ref[...] = jnp.concatenate([mu_row, sigma_row], axis=0)


def _vmem_capacity_bytes(default=64 * 1024 * 1024):
    try:
        info = pltpu.get_tpu_info()
        return int(getattr(info, "vmem_capacity_bytes", default))
    except Exception:
        return default


def regression_baseline(x, w, b):
    """x: [B, T, D] float32, w: [D, 2], b: [2] -> (mu [B, T], sigma [B, T])."""
    B, T, D = x.shape
    N = B * T
    itemsize = jnp.dtype(x.dtype).itemsize

    # ---- per-generation VMEM budget ---------------------------------------
    vmem_cap = _vmem_capacity_bytes()
    if vmem_cap <= 96 * 1024 * 1024:
        # v7x-class: 64 MiB VMEM per TensorCore, 2 TensorCores per chip.
        per_buf_budget = 12 * 1024 * 1024
        base_vmem_limit = 48 * 1024 * 1024
        two_core = True
    else:
        # v5e / v6e: 128 MiB VMEM, single TensorCore.
        per_buf_budget = 28 * 1024 * 1024
        base_vmem_limit = 100 * 1024 * 1024
        two_core = False

    # ---- tile sizing: VMEM byte budget, lane-aligned, no host-side padding --
    row_bytes = D * itemsize
    tile_rows = max(128, (per_buf_budget // row_bytes) // 128 * 128)
    n_rounded = 128 * pl.cdiv(N, 128)           # smallest lane-aligned cover of N
    tile_rows = min(tile_rows, n_rounded)
    if two_core and N > 256:
        # Guarantee >= 2 grid steps so the "parallel" axis spans both cores.
        half = 128 * pl.cdiv(pl.cdiv(N, 2), 128)
        tile_rows = max(128, min(tile_rows, half))

    grid_rows = pl.cdiv(N, tile_rows)           # ragged last block handled by Pallas

    # TODO(synk): if D is so wide that even a single 128-row x tile overflows VMEM
    # (D on the order of millions of f32), a feature-dim "arbitrary" grid axis with
    # a [2, TM] accumulator would be required; not implemented here.
    x_tile_bytes = tile_rows * D * itemsize
    out_tile_bytes = 2 * tile_rows * 4
    needed = 2 * (x_tile_bytes + out_tile_bytes) + 2 * D * itemsize + (1 << 20)
    vmem_limit = min(int(0.8 * vmem_cap), max(base_vmem_limit, needed))

    x2 = x.reshape(N, D)                        # metadata-only reshape, no copy
    wt = jnp.transpose(w).astype(x.dtype)       # [2, D]  (tiny, done once outside)
    bt = b.reshape(2, 1).astype(jnp.float32)    # [2, 1]

    cost = pl.CostEstimate(
        flops=4 * N * D,                        # [N, D] @ [D, 2]
        transcendentals=N,                      # one exp per row (sigma only)
        bytes_accessed=N * D * itemsize + 2 * D * itemsize + 2 * 4 + 2 * N * 4,
    )

    out = pl.pallas_call(
        _regression_baseline_kernel,
        out_shape=jax.ShapeDtypeStruct((2, N), jnp.float32),
        grid_spec=pltpu.PrefetchScalarGridSpec(
            num_scalar_prefetch=0,
            grid=(grid_rows,),
            in_specs=[
                pl.BlockSpec((tile_rows, D), lambda i: (i, 0)),  # x row tile
                pl.BlockSpec((2, D), lambda i: (0, 0)),          # W^T (resident)
                pl.BlockSpec((2, 1), lambda i: (0, 0)),          # bias (resident)
            ],
            out_specs=pl.BlockSpec((2, tile_rows), lambda i: (0, i)),
        ),
        compiler_params=pltpu.CompilerParams(
            dimension_semantics=("parallel",),
            vmem_limit_bytes=vmem_limit,
        ),
        cost_estimate=cost,
    )(x2, wt, bt)

    mu = out[0, :].reshape(B, T)
    sigma = out[1, :].reshape(B, T)
    return mu, sigma


if __name__ == "__main__":
    B, T, D = 2, 8, 32

    key = jax.random.PRNGKey(0)
    kx, kw, kb = jax.random.split(key, 3)

    x = jax.random.normal(kx, (B, T, D), dtype=jnp.float32)
    # nn.Linear-style deterministic init: U(-1/sqrt(D), 1/sqrt(D))
    bound = 1.0 / (D ** 0.5)
    w = jax.random.uniform(kw, (D, 2), jnp.float32, -bound, bound)
    b = jax.random.uniform(kb, (2,), jnp.float32, -bound, bound)

    mu, sigma = regression_baseline(x, w, b)
    jax.block_until_ready((mu, sigma))

    # Reference in plain JAX (mirrors the PyTorch forward semantics).
    pred_ref = jnp.einsum("btd,dk->btk", x, w,
                          precision=lax.Precision.HIGHEST) + b
    mu_ref = pred_ref[:, :, 0]
    sigma_ref = jnp.exp(pred_ref[:, :, 1])

    assert mu.shape == (B, T) and sigma.shape == (B, T)
    assert jnp.allclose(mu, mu_ref, atol=1e-5, rtol=1e-5)
    assert jnp.allclose(sigma, sigma_ref, atol=1e-5, rtol=1e-5)

    print("KERNEL_OK")
</pallas_src>

<mosaic_0001>
module attributes {stable_mosaic.version = 11 : i64} {
  func.func @_regression_baseline_kernel(%arg0: i32, %arg1: memref<128x32xf32, #tpu.memory_space<vmem>>, %arg2: memref<2x32xf32, #tpu.memory_space<vmem>>, %arg3: memref<2x1xf32, #tpu.memory_space<vmem>>, %arg4: memref<2x128xf32, #tpu.memory_space<vmem>>) attributes {dimension_semantics = [#tpu.dimension_semantics<parallel>], iteration_bounds = array<i64: 1>, scalar_prefetch = 0 : i64, scratch_operands = 0 : i64, tpu.core_type = #tpu.core_type<tc>, window_params = [{transform_indices = @transform_0, window_bounds = array<i64: 128, 32>}, {pipeline_mode = #tpu.pipeline_mode<synchronous>, transform_indices = @transform_1, window_bounds = array<i64: 2, 32>}, {pipeline_mode = #tpu.pipeline_mode<synchronous>, transform_indices = @transform_2, window_bounds = array<i64: 2, 1>}, {transform_indices = @transform_3, window_bounds = array<i64: 2, 128>}]} {
    %c0 = arith.constant 0 : index
    %c0_0 = arith.constant 0 : index
    %0 = vector.load %arg2[%c0, %c0_0] : memref<2x32xf32, #tpu.memory_space<vmem>>, vector<2x32xf32>
    %c0_1 = arith.constant 0 : index
    %c0_2 = arith.constant 0 : index
    %1 = vector.load %arg1[%c0_1, %c0_2] : memref<128x32xf32, #tpu.memory_space<vmem>>, vector<128x32xf32>
    %cst = arith.constant dense<0.000000e+00> : vector<2x128xf32>
    %2 = tpu.matmul %0, %1, %cst {dimension_numbers = #tpu.dot_dimension_numbers<[1], [1], [0], [0], [0, 0, 1, 0], [], []>, precision = #tpu.contract_precision<fp32>} : vector<2x32xf32>, vector<128x32xf32>, vector<2x128xf32> -> vector<2x128xf32>
    %c0_3 = arith.constant 0 : index
    %c0_4 = arith.constant 0 : index
    %3 = vector.load %arg3[%c0_3, %c0_4] : memref<2x1xf32, #tpu.memory_space<vmem>>, vector<2x1xf32>
    %4 = vector.broadcast %3 : vector<2x1xf32> to vector<2x128xf32>
    %5 = arith.addf %2, %4 : vector<2x128xf32>
    %6 = vector.extract_strided_slice %5 {offsets = [0, 0], sizes = [1, 128], strides = [1, 1]} : vector<2x128xf32> to vector<1x128xf32>
    %7 = vector.extract_strided_slice %5 {offsets = [1, 0], sizes = [1, 128], strides = [1, 1]} : vector<2x128xf32> to vector<1x128xf32>
    %8 = math.exp %7 : vector<1x128xf32>
    %9 = tpu.concatenate %6, %8 in 0 : vector<1x128xf32>, vector<1x128xf32> -> vector<2x128xf32>
    %c0_5 = arith.constant 0 : index
    %c0_6 = arith.constant 0 : index
    %10 = vector.load %arg4[%c0_5, %c0_6] : memref<2x128xf32, #tpu.memory_space<vmem>>, vector<2x128xf32>
    tpu.vector_store %arg4[%c0_5, %c0_6], %9 {strides = array<i32>} : memref<2x128xf32, #tpu.memory_space<vmem>>, vector<2x128xf32>,
    return
  }
  func.func @transform_0(%arg0: i32) -> (i32, i32) {
    %c0_i32 = arith.constant 0 : i32
    %c0_i32_0 = arith.constant 0 : i32
    return %arg0, %c0_i32 : i32, i32
  }
  func.func @transform_1(%arg0: i32) -> (i32, i32) {
    %c0_i32 = arith.constant 0 : i32
    %c0_i32_0 = arith.constant 0 : i32
    %c0_i32_1 = arith.constant 0 : i32
    return %c0_i32, %c0_i32_0 : i32, i32
  }
  func.func @transform_2(%arg0: i32) -> (i32, i32) {
    %c0_i32 = arith.constant 0 : i32
    %c0_i32_0 = arith.constant 0 : i32
    %c0_i32_1 = arith.constant 0 : i32
    return %c0_i32, %c0_i32_0 : i32, i32
  }
  func.func @transform_3(%arg0: i32) -> (i32, i32) {
    %c0_i32 = arith.constant 0 : i32
    %c0_i32_0 = arith.constant 0 : i32
    return %c0_i32, %arg0 : i32, i32
  }
}

</mosaic_0001>

<bundles_post_ra>
// kernel: tpu_custom_call.1
= control target key start
LH: loop header
LB: loop body
LE: loop exit
PB: predicated region body
PF: predicated region fallthrough
CT: control target
= control target key end

     0   :  { %8 = vsyncpa [#allocation3], 0  ;;  %s1550_s0 = inlined_call_operand.hbm [shape: f32[16,32], index: 0, kind: input, shape index: {}]   ;;  %s1551_s1 = inlined_call_operand.vmem [shape: f32[2,32], index: 1, kind: input, shape index: {}]   ;;  %s1552_s2 = inlined_call_operand.vmem [shape: f32[2,1], index: 2, kind: input, shape index: {}]   ;;  %s1553_s3 = inlined_call_operand.hbm [shape: f32[2,16], index: 3, kind: output, shape index: {}]  }
   0x1   :  { %9 = vsyncpa [#allocation4], 0 }
   0x2   :  { %14 = vsyncadd [#allocation3], 1792  ;;  %s1131_s12 = smov [#allocation2]  }
   0x3   :  { %s15_s13 = sshll.u32 %s1131_s12, 4  ;;  %s16_s13 = int_to_ptr.vmem [resolvable:$true] %s15_s13 }
   0x4   :  { %s1095_s14 = scalar_lea.vmem %s16_s13, 256  ;;  %s1099_s15 = scalar_lea.vmem %s16_s13, 2048 }
   0x5   :  { %p1096_p0 = scmp.ne.s32.totalorder %s16_s13, %s1095_s14  ;;  %p1100_p1 = scmp.lt.s32.totalorder %s16_s13, %s16_s13 }
   0x6   :  { %p1101_p2 = scmp.lt.s32.totalorder %s1099_s15, %s1095_s14 }
   0x8   :  { %p1102_p3 = por %p1101_p2, %p1100_p1 }
   0xa   :  { %p1103_p4 = pnand %p1102_p3, %p1096_p0 }
   0xc   :  { %1106 = shalt.err (!%p1103_p4)
}
   0xd   :  { %s1132_s16 = smov 128   ;;  %s1133_s17 = smov 8  }
   0xe   :  { %21 = dma.hbm_to_vmem [thread:$0]  %s1550_s0, 256, %s16_s13, [#allocation3], %s1132_s16, %s1132_s16, %s1133_s17  }
   0xf   :  { %1127 = dma.done.wait [#allocation3], 2048  }
  0x10   :  { %1128 = vsyncadd [#allocation3], 4294965248  ;;  %v1134_v0 = vmov 0.0   ;;  %vm1135_vm0 = vmmov 0   ;;  %vm52_vm1 = vcmask 261120   ;;  %v45_v1 = vld [vmem:[#allocation2 + $0x78] sm:$0xff] }
  0x11   :  { %867 = vmatprep.subr.mxu0 %v1134_v0  ;;  %902 = vmatprep.subr.mxu1 %v1134_v0  ;;  %v44_v2 = vld [vmem:[#allocation2 + $0x70] sm:$0xff]  ;;  %v43_v3 = vld [vmem:[#allocation2 + $0x68] sm:$0xff]  ;;  %v102_v4 = vsel %vm52_vm1, %v45_v1, 0  ;;  %v42_v7 = vld [vmem:[#allocation2 + $0x60] sm:$0xff]  ;;  %v1136_v58 = vmov 0   ;;  %vm747_vm2 = vcmask 1040384  }
  0x12   :  { %899 = vmatprep.mubr.msk.f32.mxu0 %vm1135_vm0, %v1134_v0  ;;  %934 = vmatprep.mubr.msk.f32.mxu1 %vm1135_vm0, %v1134_v0  ;;  %v99_v5 = vsel %vm52_vm1, %v44_v2, 0  ;;  %v96_v6 = vsel %vm52_vm1, %v43_v3, 0  ;;  %v41_v8 = vld [vmem:[#allocation2 + $0x58] sm:$0xff]  ;;  %v1170_v9 = vand.u32 4294901760, %v102_v4  ;;  %v93_v12 = vsel %vm52_vm1, %v42_v7, 0  ;;  %v40_v18 = vld [vmem:[#allocation2 + $0x50] sm:$0xff] }
  0x13   :  { %v1172_v10 = vand.u32 4294901760, %v99_v5  ;;  %v1174_v11 = vand.u32 4294901760, %v96_v6  ;;  %v1177_v13 = vand.u32 4294901760, %v93_v12  ;;  %v90_v16 = vsel %vm52_vm1, %v41_v8, 0  ;;  %v39_v27 = vld [vmem:[#allocation2 + $0x48] sm:$0xff]  ;;  %v38_v35 = vld [vmem:[#allocation2 + $0x40] sm:$0xff]  ;;  %1084 = vset.pattern.permute.xlu0 %v1136_v58 }
  0x14   :  { %868 = vmatpush3.xpose.msra.mxu0 %v1170_v9  ;;  %v1181_v14 = vsub.f32 %v102_v4, %v1170_v9  ;;  %v1193_v21 = vand.u32 4294901760, %v90_v16  ;;  %v87_v22 = vsel %vm52_vm1, %v40_v18, 0  ;;  %v84_v30 = vsel %vm52_vm1, %v39_v27, 0  ;;  %v37_v42 = vld [vmem:[#allocation2 + $0x38] sm:$0xff]  ;;  %v36_v49 = vld [vmem:[#allocation2 + $0x30] sm:$0xff]  ;;  %v35_v56 = vld [vmem:[#allocation2 + $0x28] sm:$0xff] }
  0x15   :  { %v1184_v15 = vsub.f32 %v99_v5, %v1172_v10  ;;  %v1188_v17 = vsub.f32 %v96_v6, %v1174_v11  ;;  %869 = vmatprep.subr.mxu0 %v1134_v0  ;;  %v1205_v26 = vsub.f32 %v93_v12, %v1177_v13  ;;  %v1208_v29 = vand.u32 4294901760, %v87_v22  ;;  %v46_v57 = vld [vmem:[%s1552_s2] sm:$0x3]  ;;  %v33_v12 = vld [vmem:[#allocation2 + $0x18] sm:$0xff] }
  0x16   :  { %v198_v19 = vand.u32 4294901760, %v1181_v14  ;;  %v1217_v34 = vsub.f32 %v90_v16, %v1193_v21  ;;  %v1221_v36 = vand.u32 4294901760, %v84_v30  ;;  %v81_v41 = vsel %vm52_vm1, %v38_v35, 0  ;;  %49 = vperm.xlu0 %1084, %v46_v57   ;;  %v34_v2 = vld [vmem:[#allocation2 + $0x20] sm:$0xff] }
  0x17   :  { %v205_v20 = vand.u32 4294901760, %v1184_v15  ;;  %v212_v25 = vand.u32 4294901760, %v1188_v17  ;;  %v219_v33 = vand.u32 4294901760, %v1205_v26  ;;  %v1224_v37 = vsub.f32 %v87_v22, %v1208_v29 }
  0x18   :  { %870 = vmatpush3.xpose.msra.mxu0 %v1172_v10  ;;  %v199_v23 = vsub.f32 %v1181_v14, %v198_v19  ;;  %v226_v40 = vand.u32 4294901760, %v1217_v34  ;;  %v1234_v43 = vand.u32 4294901760, %v81_v41  ;;  %v78_v47 = vsel %vm52_vm1, %v37_v42, 0  ;;  %v29_v42 = vld [vmem:[%s1551_s1] sm:$0x3]  ;;  %s1137_s1 = smov [#allocation5]  }
  0x19   :  { %v206_v24 = vsub.f32 %v1184_v15, %v205_v20  ;;  %871 = vmatprep.subr.mxu0 %v1134_v0  ;;  %v213_v32 = vsub.f32 %v1188_v17, %v212_v25  ;;  %v220_v39 = vsub.f32 %v1205_v26, %v219_v33  ;;  %v233_v44 = vand.u32 4294901760, %v1224_v37  ;;  %s756_s22 = sshll.u32 %s1137_s1, 4  ;;  %s757_s22 = int_to_ptr.vmem [resolvable:$true] %s756_s22 }
  0x1a   :  { %v200_v28 = vand.u32 4294901760, %v199_v23  ;;  %v227_v46 = vsub.f32 %v1217_v34, %v226_v40  ;;  %v1243_v48 = vsub.f32 %v84_v30, %v1221_v36  ;;  %v1250_v51 = vand.u32 4294901760, %v78_v47  ;;  %s1107_s23 = scalar_lea.vmem %s757_s22, 32  ;;  %p1112_p6 = scmp.lt.s32.totalorder %s757_s22, %s757_s22 }
  0x1b   :  { %v207_v31 = vand.u32 4294901760, %v206_v24  ;;  %v214_v38 = vand.u32 4294901760, %v213_v32  ;;  %v221_v45 = vand.u32 4294901760, %v220_v39  ;;  %v234_v50 = vsub.f32 %v1224_v37, %v233_v44  ;;  %p1108_p5 = scmp.ne.s32.totalorder %s757_s22, %s1107_s23  ;;  %p1113_p7 = scmp.lt.s32.totalorder %s1107_s23, %s1107_s23 }
  0x1c   :  { %872 = vmatpush3.xpose.msra.mxu0 %v1174_v11  ;;  %903 = vmatpush3.xpose.msra.mxu1 %v200_v28  ;;  %v228_v52 = vand.u32 4294901760, %v227_v46  ;;  %v240_v53 = vand.u32 4294901760, %v1243_v48  ;;  %v75_v54 = vsel %vm52_vm1, %v36_v49, 0  ;;  %v1256_v55 = vsub.f32 %v81_v41, %v1234_v43  ;;  %v32_v28 = vld [vmem:[#allocation2 + $0x10] sm:$0xff]  ;;  %v31_v41 = vld [vmem:[#allocation2 + $0x8] sm:$0xff] }
  0x1d   :  { %873 = vmatprep.subr.mxu0 %v1134_v0  ;;  %904 = vmatprep.subr.mxu1 %v1134_v0  ;;  %v1263_v59 = vand.u32 4294901760, %v75_v54  ;;  %v72_v60 = vsel %vm52_vm1, %v35_v56, 0  ;;  %v235_v61 = vand.u32 4294901760, %v234_v50  ;;  %v1272_v1 = vsub.f32 %v78_v47, %v1250_v51  ;;  %p1114_p8 = por %p1113_p7, %p1112_p6 }
  0x1e   :  { %v241_v62 = vsub.f32 %v1243_v48, %v240_v53  ;;  %v247_v63 = vand.u32 4294901760, %v1256_v55  ;;  %v1276_v3 = vand.u32 4294901760, %v72_v60  ;;  %v69_v4 = vsel %vm52_vm1, %v34_v2, 0 }
  0x1f   :  { %v254_v7 = vand.u32 4294901760, %v1272_v1  ;;  %v1285_v8 = vsub.f32 %v75_v54, %v1263_v59  ;;  %v1289_v16 = vand.u32 4294901760, %v69_v4  ;;  %v66_v18 = vsel %vm52_vm1, %v33_v12, 0  ;;  %v30_v54 = vld [vmem:[#allocation2] sm:$0xff]  ;;  %p1115_p9 = pnand %p1114_p8, %p1108_p5 }
  0x20   :  { %874 = vmatpush3.xpose.msra.mxu0 %v1177_v13  ;;  %905 = vmatpush3.xpose.msra.mxu1 %v207_v31  ;;  %v242_v5 = vand.u32 4294901760, %v241_v62  ;;  %v248_v6 = vsub.f32 %v1256_v55, %v247_v63  ;;  %v1298_v27 = vsub.f32 %v72_v60, %v1276_v3  ;;  %v1302_v30 = vand.u32 4294901760, %v66_v18 }
  0x21   :  { %875 = vmatprep.subr.mxu0 %v1134_v0  ;;  %906 = vmatprep.subr.mxu1 %v1134_v0  ;;  %v255_v23 = vsub.f32 %v1272_v1, %v254_v7  ;;  %v261_v24 = vand.u32 4294901760, %v1285_v8  ;;  %v1305_v31 = vsub.f32 %v69_v4, %v1289_v16  ;;  %v63_v39 = vsel %vm52_vm1, %v32_v28, 0 }
  0x22   :  { %v249_v22 = vand.u32 4294901760, %v248_v6  ;;  %v60_v47 = vsel %vm52_vm1, %v31_v41, 0  ;;  %v54_v56 = vsel %vm52_vm1, %v29_v42, 0  ;;  %v57_v58 = vsel %vm52_vm1, %v30_v54, 0 }
  0x23   :  { %v256_v32 = vand.u32 4294901760, %v255_v23  ;;  %v262_v35 = vsub.f32 %v1285_v8, %v261_v24  ;;  %v275_v46 = vand.u32 4294901760, %v1305_v31  ;;  %v1332_v57 = vand.u32 4294901760, %v60_v47 }
  0x24   :  { %876 = vmatpush3.xpose.msra.mxu0 %v1193_v21  ;;  %907 = vmatpush3.xpose.msra.mxu1 %v214_v38  ;;  %v268_v38 = vand.u32 4294901760, %v1298_v27  ;;  %v1335_v60 = vand.u32 4294901760, %v54_v56 }
  0x25   :  { %877 = vmatprep.subr.mxu0 %v1134_v0  ;;  %908 = vmatprep.subr.mxu1 %v1134_v0  ;;  %v263_v49 = vand.u32 4294901760, %v262_v35  ;;  %v276_v62 = vsub.f32 %v1305_v31, %v275_v46  ;;  %v1358_v23 = vsub.f32 %v60_v47, %v1332_v57 }
  0x26   :  { %v269_v50 = vsub.f32 %v1298_v27, %v268_v38  ;;  %v1350_v6 = vsub.f32 %v54_v56, %v1335_v60 }
  0x27   :  { %v277_v12 = vand.u32 4294901760, %v276_v62 }
  0x28   :  { %878 = vmatpush3.xpose.msra.mxu0 %v1208_v29  ;;  %909 = vmatpush3.xpose.msra.mxu1 %v221_v45  ;;  %v1318_v45 = vand.u32 4294901760, %v63_v39  ;;  %v187_v28 = vand.u32 4294901760, %v1350_v6 }
  0x29   :  { %879 = vmatprep.subr.mxu0 %v1134_v0  ;;  %910 = vmatprep.subr.mxu1 %v1134_v0 }
  0x2a   :  { %v1343_v4 = vsub.f32 %v63_v39, %v1318_v45  ;;  %v296_v39 = vand.u32 4294901760, %v1358_v23  ;;  %v188_v42 = vsub.f32 %v1350_v6, %v187_v28 }
  0x2c   :  { %880 = vmatpush3.xpose.msra.mxu0 %v1221_v36  ;;  %911 = vmatpush3.xpose.msra.mxu1 %v228_v52  ;;  %v1327_v52 = vsub.f32 %v66_v18, %v1302_v30  ;;  %v189_v54 = vand.u32 4294901760, %v188_v42 }
  0x2d   :  { %881 = vmatprep.subr.mxu0 %v1134_v0  ;;  %912 = vmatprep.subr.mxu1 %v1134_v0 }
  0x2e   :  { %v282_v2 = vand.u32 4294901760, %v1327_v52 }
  0x30   :  { %882 = vmatpush3.xpose.msra.mxu0 %v1234_v43  ;;  %913 = vmatpush3.xpose.msra.mxu1 %v235_v61  ;;  %v270_v61 = vand.u32 4294901760, %v269_v50  ;;  %v283_v18 = vsub.f32 %v1327_v52, %v282_v2 }
  0x31   :  { %883 = vmatprep.subr.mxu0 %v1134_v0  ;;  %914 = vmatprep.subr.mxu1 %v1134_v0 }
  0x34   :  { %884 = vmatpush3.xpose.msra.mxu0 %v1250_v51  ;;  %915 = vmatpush3.xpose.msra.mxu1 %v242_v5  ;;  %v1347_v5 = vand.u32 4294901760, %v57_v58 }
  0x35   :  { %885 = vmatprep.subr.mxu0 %v1134_v0  ;;  %916 = vmatprep.subr.mxu1 %v1134_v0 }
  0x36   :  { %v1369_v41 = vsub.f32 %v57_v58, %v1347_v5 }
  0x38   :  { %886 = vmatpush3.xpose.msra.mxu0 %v1263_v59  ;;  %917 = vmatpush3.xpose.msra.mxu1 %v249_v22  ;;  %v289_v22 = vand.u32 4294901760, %v1343_v4  ;;  %v303_v50 = vand.u32 4294901760, %v1369_v41 }
  0x39   :  { %887 = vmatprep.subr.mxu0 %v1134_v0  ;;  %918 = vmatprep.subr.mxu1 %v1134_v0 }
  0x3a   :  { %v290_v35 = vsub.f32 %v1343_v4, %v289_v22  ;;  %v304_v58 = vsub.f32 %v1369_v41, %v303_v50 }
  0x3c   :  { %888 = vmatpush3.xpose.msra.mxu0 %v1276_v3  ;;  %919 = vmatpush3.xpose.msra.mxu1 %v256_v32  ;;  %v284_v32 = vand.u32 4294901760, %v283_v18  ;;  %v291_v47 = vand.u32 4294901760, %v290_v35 }
  0x3d   :  { %889 = vmatprep.subr.mxu0 %v1134_v0  ;;  %920 = vmatprep.subr.mxu1 %v1134_v0 }
  0x40   :  { %890 = vmatpush3.xpose.msra.mxu0 %v1289_v16  ;;  %921 = vmatpush3.xpose.msra.mxu1 %v263_v49  ;;  %v297_v49 = vsub.f32 %v1358_v23, %v296_v39 }
  0x41   :  { %891 = vmatprep.subr.mxu0 %v1134_v0  ;;  %922 = vmatprep.subr.mxu1 %v1134_v0 }
  0x42   :  { %v298_v56 = vand.u32 4294901760, %v297_v49 }
  0x44   :  { %892 = vmatpush3.xpose.msra.mxu0 %v1302_v30  ;;  %923 = vmatpush3.xpose.msra.mxu1 %v270_v61  ;;  %v305_v61 = vand.u32 4294901760, %v304_v58 }
  0x45   :  { %893 = vmatprep.subr.mxu0 %v1134_v0  ;;  %924 = vmatprep.subr.mxu1 %v1134_v0 }
  0x48   :  { %894 = vmatpush3.xpose.msra.mxu0 %v1318_v45  ;;  %925 = vmatpush3.xpose.msra.mxu1 %v277_v12 }
  0x49   :  { %895 = vmatprep.subr.mxu0 %v1134_v0  ;;  %926 = vmatprep.subr.mxu1 %v1134_v0 }
  0x4c   :  { %896 = vmatpush3.xpose.msra.mxu0 %v1332_v57  ;;  %927 = vmatpush3.xpose.msra.mxu1 %v284_v32 }
  0x4d   :  { %897 = vmatprep.subr.mxu0 %v1134_v0  ;;  %928 = vmatprep.subr.mxu1 %v1134_v0 }
  0x50   :  { %898 = vmatpush3.xpose.msra.mxu0 %v1347_v5  ;;  %929 = vmatpush3.xpose.msra.mxu1 %v291_v47 }
  0x51   :  { %930 = vmatprep.subr.mxu1 %v1134_v0  ;;  %937 = vmatprep.subr.mxu0 %v1134_v0 }
  0x53   :  { %900 = vmatmul.mubr.f32.vlgmr.msra.gmra.mxu0 %v189_v54 }
  0x54   :  { %931 = vmatpush3.xpose.msra.mxu1 %v298_v56  ;;  %938 = vmatpush3.xpose.msra.mxu0 %v1181_v14 }
  0x55   :  { %932 = vmatprep.subr.mxu1 %v1134_v0  ;;  %939 = vmatprep.subr.mxu0 %v1134_v0 }
  0x56   :  { %969 = vmatprep.mubr.msk.f32.mxu0 %vm1135_vm0, %v1134_v0 }
  0x58   :  { %933 = vmatpush3.xpose.msra.mxu1 %v305_v61  ;;  %940 = vmatpush3.xpose.msra.mxu0 %v1184_v15 }
  0x59   :  { %941 = vmatprep.subr.mxu0 %v1134_v0  ;;  %972 = vmatprep.subr.mxu1 %v1134_v0 }
  0x5b   :  { %935 = vmatmul.mubr.f32.vlgmr.msra.gmra.mxu1 %v1335_v60 }
  0x5c   :  { %942 = vmatpush3.xpose.msra.mxu0 %v1188_v17  ;;  %973 = vmatpush3.xpose.msra.mxu1 %v1170_v9 }
  0x5d   :  { %943 = vmatprep.subr.mxu0 %v1134_v0  ;;  %974 = vmatprep.subr.mxu1 %v1134_v0 }
  0x5e   :  { %1004 = vmatprep.mubr.msk.f32.mxu1 %vm1135_vm0, %v1134_v0 }
  0x60   :  { %944 = vmatpush3.xpose.msra.mxu0 %v1205_v26  ;;  %975 = vmatpush3.xpose.msra.mxu1 %v1172_v10 }
  0x61   :  { %945 = vmatprep.subr.mxu0 %v1134_v0  ;;  %976 = vmatprep.subr.mxu1 %v1134_v0 }
  0x64   :  { %946 = vmatpush3.xpose.msra.mxu0 %v1217_v34  ;;  %977 = vmatpush3.xpose.msra.mxu1 %v1174_v11 }
  0x65   :  { %947 = vmatprep.subr.mxu0 %v1134_v0  ;;  %978 = vmatprep.subr.mxu1 %v1134_v0 }
  0x68   :  { %948 = vmatpush3.xpose.msra.mxu0 %v1224_v37  ;;  %979 = vmatpush3.xpose.msra.mxu1 %v1177_v13 }
  0x69   :  { %949 = vmatprep.subr.mxu0 %v1134_v0  ;;  %980 = vmatprep.subr.mxu1 %v1134_v0 }
  0x6c   :  { %950 = vmatpush3.xpose.msra.mxu0 %v1243_v48  ;;  %981 = vmatpush3.xpose.msra.mxu1 %v1193_v21 }
  0x6d   :  { %951 = vmatprep.subr.mxu0 %v1134_v0  ;;  %982 = vmatprep.subr.mxu1 %v1134_v0 }
  0x70   :  { %952 = vmatpush3.xpose.msra.mxu0 %v1256_v55  ;;  %983 = vmatpush3.xpose.msra.mxu1 %v1208_v29 }
  0x71   :  { %953 = vmatprep.subr.mxu0 %v1134_v0  ;;  %984 = vmatprep.subr.mxu1 %v1134_v0 }
  0x74   :  { %954 = vmatpush3.xpose.msra.mxu0 %v1272_v1  ;;  %985 = vmatpush3.xpose.msra.mxu1 %v1221_v36 }
  0x75   :  { %955 = vmatprep.subr.mxu0 %v1134_v0  ;;  %986 = vmatprep.subr.mxu1 %v1134_v0 }
  0x78   :  { %956 = vmatpush3.xpose.msra.mxu0 %v1285_v8  ;;  %987 = vmatpush3.xpose.msra.mxu1 %v1234_v43 }
  0x79   :  { %957 = vmatprep.subr.mxu0 %v1134_v0  ;;  %988 = vmatprep.subr.mxu1 %v1134_v0 }
  0x7c   :  { %958 = vmatpush3.xpose.msra.mxu0 %v1298_v27  ;;  %989 = vmatpush3.xpose.msra.mxu1 %v1250_v51 }
  0x7d   :  { %959 = vmatprep.subr.mxu0 %v1134_v0  ;;  %990 = vmatprep.subr.mxu1 %v1134_v0 }
  0x80   :  { %960 = vmatpush3.xpose.msra.mxu0 %v1305_v31  ;;  %991 = vmatpush3.xpose.msra.mxu1 %v1263_v59 }
  0x81   :  { %961 = vmatprep.subr.mxu0 %v1134_v0  ;;  %992 = vmatprep.subr.mxu1 %v1134_v0 }
  0x84   :  { %962 = vmatpush3.xpose.msra.mxu0 %v1327_v52  ;;  %993 = vmatpush3.xpose.msra.mxu1 %v1276_v3 }
  0x85   :  { %963 = vmatprep.subr.mxu0 %v1134_v0  ;;  %994 = vmatprep.subr.mxu1 %v1134_v0 }
  0x88   :  { %964 = vmatpush3.xpose.msra.mxu0 %v1343_v4  ;;  %995 = vmatpush3.xpose.msra.mxu1 %v1289_v16 }
  0x89   :  { %965 = vmatprep.subr.mxu0 %v1134_v0  ;;  %996 = vmatprep.subr.mxu1 %v1134_v0 }
  0x8c   :  { %966 = vmatpush3.xpose.msra.mxu0 %v1358_v23  ;;  %997 = vmatpush3.xpose.msra.mxu1 %v1302_v30 }
  0x8d   :  { %967 = vmatprep.subr.mxu0 %v1134_v0  ;;  %998 = vmatprep.subr.mxu1 %v1134_v0 }
  0x90   :  { %968 = vmatpush3.xpose.msra.mxu0 %v1369_v41  ;;  %999 = vmatpush3.xpose.msra.mxu1 %v1318_v45 }
  0x91   :  { %1000 = vmatprep.subr.mxu1 %v1134_v0  ;;  %1007 = vmatprep.subr.mxu0 %v1134_v0 }
  0x93   :  { %970 = vmatmul.mubr.f32.vlgmr.msra.gmra.mxu0 %v1350_v6 }
  0x94   :  { %1001 = vmatpush3.xpose.msra.mxu1 %v1332_v57  ;;  %1008 = vmatpush3.xpose.msra.mxu0 %v198_v19 }
  0x95   :  { %1002 = vmatprep.subr.mxu1 %v1134_v0  ;;  %1009 = vmatprep.subr.mxu0 %v1134_v0 }
  0x96   :  { %1039 = vmatprep.mubr.msk.f32.mxu0 %vm1135_vm0, %v1134_v0 }
  0x98   :  { %1003 = vmatpush3.xpose.msra.mxu1 %v1347_v5  ;;  %1010 = vmatpush3.xpose.msra.mxu0 %v205_v20 }
  0x99   :  { %1011 = vmatprep.subr.mxu0 %v1134_v0  ;;  %1042 = vmatprep.subr.mxu1 %v1134_v0 }
  0x9b   :  { %1005 = vmatmul.mubr.f32.vlgmr.msra.gmra.mxu1 %v187_v28 }
  0x9c   :  { %1012 = vmatpush3.xpose.msra.mxu0 %v212_v25  ;;  %1043 = vmatpush3.xpose.msra.mxu1 %v1170_v9 }
  0x9d   :  { %1013 = vmatprep.subr.mxu0 %v1134_v0  ;;  %1044 = vmatprep.subr.mxu1 %v1134_v0 }
  0x9e   :  { %1074 = vmatprep.mubr.msk.f32.mxu1 %vm1135_vm0, %v1134_v0 }
  0xa0   :  { %1014 = vmatpush3.xpose.msra.mxu0 %v219_v33  ;;  %1045 = vmatpush3.xpose.msra.mxu1 %v1172_v10  ;;  %v50_v10 = vpop.permute.xlu0 %49 }
  0xa1   :  { %1015 = vmatprep.subr.mxu0 %v1134_v0  ;;  %1046 = vmatprep.subr.mxu1 %v1134_v0 }
  0xa4   :  { %1016 = vmatpush3.xpose.msra.mxu0 %v226_v40  ;;  %1047 = vmatpush3.xpose.msra.mxu1 %v1174_v11 }
  0xa5   :  { %1017 = vmatprep.subr.mxu0 %v1134_v0  ;;  %1048 = vmatprep.subr.mxu1 %v1134_v0 }
  0xa8   :  { %1018 = vmatpush3.xpose.msra.mxu0 %v233_v44  ;;  %1049 = vmatpush3.xpose.msra.mxu1 %v1177_v13 }
  0xa9   :  { %1019 = vmatprep.subr.mxu0 %v1134_v0  ;;  %1050 = vmatprep.subr.mxu1 %v1134_v0 }
  0xac   :  { %1020 = vmatpush3.xpose.msra.mxu0 %v240_v53  ;;  %1051 = vmatpush3.xpose.msra.mxu1 %v1193_v21 }
  0xad   :  { %1021 = vmatprep.subr.mxu0 %v1134_v0  ;;  %1052 = vmatprep.subr.mxu1 %v1134_v0 }
  0xb0   :  { %1022 = vmatpush3.xpose.msra.mxu0 %v247_v63  ;;  %1053 = vmatpush3.xpose.msra.mxu1 %v1208_v29 }
  0xb1   :  { %1023 = vmatprep.subr.mxu0 %v1134_v0  ;;  %1054 = vmatprep.subr.mxu1 %v1134_v0 }
  0xb4   :  { %1024 = vmatpush3.xpose.msra.mxu0 %v254_v7  ;;  %1055 = vmatpush3.xpose.msra.mxu1 %v1221_v36 }
  0xb5   :  { %1025 = vmatprep.subr.mxu0 %v1134_v0  ;;  %1056 = vmatprep.subr.mxu1 %v1134_v0 }
  0xb8   :  { %1026 = vmatpush3.xpose.msra.mxu0 %v261_v24  ;;  %1057 = vmatpush3.xpose.msra.mxu1 %v1234_v43 }
  0xb9   :  { %1027 = vmatprep.subr.mxu0 %v1134_v0  ;;  %1058 = vmatprep.subr.mxu1 %v1134_v0 }
  0xbc   :  { %1028 = vmatpush3.xpose.msra.mxu0 %v268_v38  ;;  %1059 = vmatpush3.xpose.msra.mxu1 %v1250_v51 }
  0xbd   :  { %1029 = vmatprep.subr.mxu0 %v1134_v0  ;;  %1060 = vmatprep.subr.mxu1 %v1134_v0 }
  0xc0   :  { %1030 = vmatpush3.xpose.msra.mxu0 %v275_v46  ;;  %1061 = vmatpush3.xpose.msra.mxu1 %v1263_v59 }
  0xc1   :  { %1031 = vmatprep.subr.mxu0 %v1134_v0  ;;  %1062 = vmatprep.subr.mxu1 %v1134_v0 }
  0xc4   :  { %1032 = vmatpush3.xpose.msra.mxu0 %v282_v2  ;;  %1063 = vmatpush3.xpose.msra.mxu1 %v1276_v3 }
  0xc5   :  { %1033 = vmatprep.subr.mxu0 %v1134_v0  ;;  %1064 = vmatprep.subr.mxu1 %v1134_v0 }
  0xc8   :  { %1034 = vmatpush3.xpose.msra.mxu0 %v289_v22  ;;  %1065 = vmatpush3.xpose.msra.mxu1 %v1289_v16 }
  0xc9   :  { %1035 = vmatprep.subr.mxu0 %v1134_v0  ;;  %1066 = vmatprep.subr.mxu1 %v1134_v0 }
  0xcc   :  { %1036 = vmatpush3.xpose.msra.mxu0 %v296_v39  ;;  %1067 = vmatpush3.xpose.msra.mxu1 %v1302_v30 }
  0xcd   :  { %1037 = vmatprep.subr.mxu0 %v1134_v0  ;;  %1068 = vmatprep.subr.mxu1 %v1134_v0 }
  0xd0   :  { %1038 = vmatpush3.xpose.msra.mxu0 %v303_v50  ;;  %1069 = vmatpush3.xpose.msra.mxu1 %v1318_v45 }
  0xd1   :  { %1070 = vmatprep.subr.mxu1 %v1134_v0 }
  0xd3   :  { %1040 = vmatmul.mubr.f32.vlgmr.msra.gmra.mxu0 %v1335_v60 }
  0xd4   :  { %1071 = vmatpush3.xpose.msra.mxu1 %v1332_v57 }
  0xd5   :  { %1072 = vmatprep.subr.mxu1 %v1134_v0 }
  0xd8   :  { %1073 = vmatpush3.xpose.msra.mxu1 %v1347_v5 }
  0xdb   :  { %1075 = vmatmul.mubr.f32.vlgmr.msra.gmra.mxu1 %v1335_v60 }
 0x113   :  { %v191_v9 = vpop.f32.mrf.mxu0 }
 0x114   :  { %v192_v13 = vadd.f32 %v191_v9, %v50_v10 }
 0x115   :  { %v901_v11 = vpop.f32.mrf.mxu0 }
 0x11b   :  { %v342_v14 = vpop.f32.mrf.mxu1 }
 0x11c   :  { %v343_v15 = vadd.f32 %v342_v14, %v192_v13 }
 0x11d   :  { %v936_v17 = vpop.f32.mrf.mxu1 }
 0x153   :  { %v446_v19 = vpop.f32.mrf.mxu0 }
 0x154   :  { %v447_v20 = vadd.f32 %v446_v19, %v343_v15 }
 0x155   :  { %v971_v21 = vpop.f32.mrf.mxu0 }
 0x15b   :  { %v535_v25 = vpop.f32.mrf.mxu1 }
 0x15c   :  { %v536_v34 = vadd.f32 %v535_v25, %v447_v20 }
 0x15d   :  { %v1006_v26 = vpop.f32.mrf.mxu1 }
 0x193   :  { %v654_v29 = vpop.f32.mrf.mxu0 }
 0x194   :  { %v655_v0 = vadd.f32 %v654_v29, %v536_v34 }
 0x195   :  { %v1041_v33 = vpop.f32.mrf.mxu0 }
 0x19b   :  { %v741_v36 = vpop.f32.mrf.mxu1 }
 0x19c   :  { %v742_v37 = vadd.f32 %v741_v36, %v655_v0 }
 0x19d   :  { %v1076_v40 = vpop.f32.mrf.mxu1 }
 0x19e   :  { %v745_v43 = vmul.f32 1.442695, %v742_v37 }
 0x1a0   :  { %1085 = vpow2.f32 %v745_v43 }
 0x1ad   :  { %v1086_v44 = vpop.eup %1085 }
 0x1ae   :  { %v748_v48 = vsel %vm747_vm2, %v742_v37, %v1086_v44 }
 0x1af   :  { %749 = vst [vmem:[#allocation5] sm:$0x3] %v748_v48 }
 0x1b0   :  { %1118 = shalt.err (!%p1115_p9)
}
 0x1b1   :  { %759 = dma.vmem_to_hbm [thread:$0]  %s757_s22, 32, %s1553_s3, [#allocation4]  }
 0x1b2   :  { %1129 = dma.done.wait [#allocation4], 32  }
 0x1b3   :  { %1130 = vsyncadd [#allocation4], 4294967264 }
 0x1b4   :  { %763 = vsyncpa [#allocation3], 1 }
 0x1b5   :  { %764 = vsyncpa [#allocation4], 1 }

</bundles_post_ra>
